<compile_context>
chip_gen: v6e
topology: v6e:2x2x1
jax: 0.10.0
libtpu: 0.0.40
codegen_flags: <defaults>
</compile_context>

<pallas_src>
import jax
import jax.numpy as jnp
from jax.experimental import pallas as pl
from jax.experimental.pallas import tpu as pltpu

_LANES = 128
_VMEM_BUDGET_BYTES = 4 * 1024 * 1024  # double-buffered blocks; fits all gens' defaults
_MAX_TILE_B = 8192                    # keeps per-step DMA sizes reasonable


def _accuracy_kernel(preds_ref, labels_ref, correct_ref, acc_ref):
    """Grid = (chunks, steps).  Accumulates lane-dense correct counts per chunk."""
    step = pl.program_id(1)

    @pl.when(step == 0)
    def _():
        acc_ref[...] = jnp.zeros_like(acc_ref)

    preds = preds_ref[...].astype(jnp.float32)   # (C, TILE_B); per-tile cast
    labels = labels_ref[...]                     # (1, TILE_B) int32
    num_classes, tile_b = preds.shape

    # argmax over the class (sublane) axis with smallest-index tie-breaking,
    # built from a sublane iota + max/min reductions (keeps logical shapes so
    # Mosaic masks the padded sublanes).
    row = jax.lax.broadcasted_iota(jnp.int32, (num_classes, tile_b), 0)
    maxv = jnp.max(preds, axis=0, keepdims=True)                  # (1, TILE_B)
    masked_idx = jnp.where(preds == maxv, row, num_classes)
    pred_idx = jnp.min(masked_idx, axis=0, keepdims=True)         # (1, TILE_B)

    # Lane-dense partial counts; padded columns carry label == -1 -> never hit.
    acc_ref[...] = acc_ref[...] + (pred_idx == labels).astype(jnp.int32)

    @pl.when(step == pl.num_programs(1) - 1)
    def _():
        s = jnp.sum(acc_ref[...], axis=1, keepdims=True)          # (1, 1)
        correct_ref[...] = s.reshape(1, 1, 1)


def _round_up(x, m):
    return ((x + m - 1) // m) * m


def _choose_tile_b(batch, num_classes, pred_itemsize, max_tile_b):
    """Largest lane-dense tile (multiple of 128 cols) that fits the VMEM budget."""
    # double-buffered preds + labels blocks, plus the int32 accumulator.
    per_col = 2 * (num_classes * pred_itemsize + 4) + 4
    cols = max(_LANES, _VMEM_BUDGET_BYTES // per_col)
    tile_b = (cols // _LANES) * _LANES
    tile_b = min(tile_b, max_tile_b, _round_up(batch, _LANES))
    return max(_LANES, tile_b)


def _accuracy_counts(preds, labels, *, max_tile_b=_MAX_TILE_B):
    """preds: [B, C] (any float dtype), labels: [B] int -> (correct, total) int32."""
    batch, num_classes = preds.shape
    tile_b = _choose_tile_b(batch, num_classes, preds.dtype.itemsize, max_tile_b)

    n_steps = (batch + tile_b - 1) // tile_b
    n_chunks = 2 if n_steps >= 2 else 1      # 2 TensorCores on v7x; harmless elsewhere
    padded = _round_up(batch, tile_b * n_chunks)
    spc = padded // (tile_b * n_chunks)      # steps per chunk

    # Lane-dense layout: classes -> sublanes, batch -> lanes (native dtype kept).
    preds_t = jnp.pad(preds.T, ((0, 0), (0, padded - batch)))
    labels_row = jnp.pad(labels.astype(jnp.int32).reshape(1, batch),
                         ((0, 0), (0, padded - batch)), constant_values=-1)

    partials = pl.pallas_call(
        _accuracy_kernel,
        out_shape=jax.ShapeDtypeStruct((n_chunks, 1, 1), jnp.int32),
        grid_spec=pltpu.PrefetchScalarGridSpec(
            num_scalar_prefetch=0,
            grid=(n_chunks, spc),
            in_specs=[
                pl.BlockSpec((num_classes, tile_b), lambda c, i: (0, c * spc + i)),
                pl.BlockSpec((1, tile_b), lambda c, i: (0, c * spc + i)),
            ],
            out_specs=pl.BlockSpec((1, 1, 1), lambda c, i: (c, 0, 0)),
            scratch_shapes=[pltpu.VMEM((1, tile_b), jnp.int32)],
        ),
        compiler_params=pltpu.CompilerParams(
            dimension_semantics=("parallel", "arbitrary"),
            vmem_limit_bytes=32 * 1024 * 1024,
        ),
    )(preds_t, labels_row)

    correct = jnp.sum(partials)
    return correct, jnp.int32(batch)


class Metric:
    """JAX/Pallas mirror of graphgallery's abstract Metric base class."""

    def __init__(self, name=None, dtype=None, **kwargs):
        self.name = name
        self.dtype = dtype
        self.reset_states()

    def forward(self, *args, **kwargs):
        raise NotImplementedError

    def update_state(self, *args, **kwargs):
        raise NotImplementedError

    def reset_states(self):
        raise NotImplementedError

    def result(self):
        raise NotImplementedError


class Accuracy(Metric):
    """Concrete streaming-accuracy metric; hot path runs in the Pallas kernel."""

    def reset_states(self):
        self._correct = jnp.int32(0)
        self._total = jnp.int32(0)

    def update_state(self, y_true, y_pred):
        correct, total = _accuracy_counts(y_pred, y_true)
        self._correct = self._correct + correct
        self._total = self._total + total
        return self

    def forward(self, y_true, y_pred):
        self.update_state(y_true, y_pred)
        return self.result()

    def result(self):
        total = jnp.maximum(self._total, 1).astype(jnp.float32)
        return self._correct.astype(jnp.float32) / total


if __name__ == "__main__":
    key = jax.random.PRNGKey(0)
    kp, kl = jax.random.split(key)

    # Deliberately ragged batch (not a multiple of 128) with bf16 logits to
    # exercise padding/masking and the native-dtype input path.
    batch, num_classes = 300, 8
    preds = jax.random.normal(kp, (batch, num_classes), jnp.float32).astype(jnp.bfloat16)
    labels = jax.random.randint(kl, (batch,), 0, num_classes, dtype=jnp.int32)

    ref_correct = jnp.sum(jnp.argmax(preds, axis=-1) == labels).astype(jnp.int32)
    ref_acc = ref_correct.astype(jnp.float32) / batch

    # 1) Metric-style streaming API (single-tile fast path at this size).
    metric = Accuracy(name="acc", dtype=jnp.float32)
    acc = jax.block_until_ready(metric.forward(labels, preds))
    assert jnp.allclose(acc, ref_acc, atol=1e-6), (acc, ref_acc)

    # 2) Multi-tile / dual-chunk grid path (the path large batches take).
    correct, total = _accuracy_counts(preds, labels, max_tile_b=128)
    correct = jax.block_until_ready(correct)
    assert int(correct) == int(ref_correct), (int(correct), int(ref_correct))
    assert int(total) == batch, (int(total), batch)

    print("KERNEL_OK")
</pallas_src>

<mosaic_0001>
module attributes {stable_mosaic.version = 11 : i64} {
  func.func @_accuracy_kernel(%arg0: i32, %arg1: i32, %arg2: memref<8x384xbf16, #tpu.memory_space<vmem>>, %arg3: memref<1x384xi32, #tpu.memory_space<vmem>>, %arg4: memref<1x1x1xi32, #tpu.memory_space<vmem>>, %arg5: memref<1x384xi32, #tpu.memory_space<vmem>>) attributes {dimension_semantics = [#tpu.dimension_semantics<parallel>, #tpu.dimension_semantics<arbitrary>], iteration_bounds = array<i64: 1, 1>, scalar_prefetch = 0 : i64, scratch_operands = 1 : i64, tpu.core_type = #tpu.core_type<tc>, window_params = [{transform_indices = @transform_0, window_bounds = array<i64: 8, 384>}, {transform_indices = @transform_1, window_bounds = array<i64: 1, 384>}, {transform_indices = @transform_2, window_bounds = array<i64: 1, 1, 1>}]} {
    %c0_i32 = arith.constant 0 : i32
    %0 = arith.cmpi eq, %arg1, %c0_i32 : i32
    %1 = arith.extui %0 : i1 to i32
    %c0_i32_0 = arith.constant 0 : i32
    %2 = arith.cmpi ne, %1, %c0_i32_0 : i32
    scf.if %2 {
      %c0_i32_11 = arith.constant 0 : i32
      %23 = vector.broadcast %c0_i32_11 : i32 to vector<1x384xi32>
      %c0_12 = arith.constant 0 : index
      %c0_13 = arith.constant 0 : index
      %24 = vector.load %arg5[%c0_12, %c0_13] : memref<1x384xi32, #tpu.memory_space<vmem>>, vector<1x384xi32>
      tpu.vector_store %arg5[%c0_12, %c0_13], %23 {strides = array<i32>} : memref<1x384xi32, #tpu.memory_space<vmem>>, vector<1x384xi32>,
    } else {
    }
    %c0 = arith.constant 0 : index
    %c0_1 = arith.constant 0 : index
    %3 = vector.load %arg2[%c0, %c0_1] : memref<8x384xbf16, #tpu.memory_space<vmem>>, vector<8x384xbf16>
    %4 = arith.extf %3 : vector<8x384xbf16> to vector<8x384xf32>
    %c0_2 = arith.constant 0 : index
    %c0_3 = arith.constant 0 : index
    %5 = vector.load %arg3[%c0_2, %c0_3] : memref<1x384xi32, #tpu.memory_space<vmem>>, vector<1x384xi32>
    %6 = tpu.iota {dimensions = array<i32: 0>} : vector<8x384xi32>
    %cst = arith.constant dense<0xFF800000> : vector<384xf32>
    %7 = vector.multi_reduction <maximumf>, %4, %cst [0] : vector<8x384xf32> to vector<384xf32>
    %8 = vector.shape_cast %7 : vector<384xf32> to vector<1x384xf32>
    %9 = vector.broadcast %8 : vector<1x384xf32> to vector<8x384xf32>
    %10 = arith.cmpf oeq, %4, %9 : vector<8x384xf32>
    %c8_i32 = arith.constant 8 : i32
    %11 = vector.broadcast %c8_i32 : i32 to vector<8x384xi32>
    %12 = arith.select %10, %6, %11 : vector<8x384xi1>, vector<8x384xi32>
    %cst_4 = arith.constant dense<2147483647> : vector<384xi32>
    %13 = vector.multi_reduction <minsi>, %12, %cst_4 [0] : vector<8x384xi32> to vector<384xi32>
    %14 = vector.shape_cast %13 : vector<384xi32> to vector<1x384xi32>
    %c0_5 = arith.constant 0 : index
    %c0_6 = arith.constant 0 : index
    %15 = vector.load %arg5[%c0_5, %c0_6] : memref<1x384xi32, #tpu.memory_space<vmem>>, vector<1x384xi32>
    %16 = arith.cmpi eq, %14, %5 : vector<1x384xi32>
    %17 = arith.extui %16 : vector<1x384xi1> to vector<1x384xi32>
    %18 = arith.addi %15, %17 : vector<1x384xi32>
    %c0_7 = arith.constant 0 : index
    %c0_8 = arith.constant 0 : index
    %19 = vector.load %arg5[%c0_7, %c0_8] : memref<1x384xi32, #tpu.memory_space<vmem>>, vector<1x384xi32>
    tpu.vector_store %arg5[%c0_7, %c0_8], %18 {strides = array<i32>} : memref<1x384xi32, #tpu.memory_space<vmem>>, vector<1x384xi32>,
    %c0_i32_9 = arith.constant 0 : i32
    %20 = arith.cmpi eq, %arg1, %c0_i32_9 : i32
    %21 = arith.extui %20 : i1 to i32
    %c0_i32_10 = arith.constant 0 : i32
    %22 = arith.cmpi ne, %21, %c0_i32_10 : i32
    scf.if %22 {
      %c0_11 = arith.constant 0 : index
      %c0_12 = arith.constant 0 : index
      %23 = vector.load %arg5[%c0_11, %c0_12] : memref<1x384xi32, #tpu.memory_space<vmem>>, vector<1x384xi32>
      %cst_13 = arith.constant dense<0> : vector<1xi32>
      %24 = vector.multi_reduction <add>, %23, %cst_13 [1] : vector<1x384xi32> to vector<1xi32>
      %25 = vector.shape_cast %24 : vector<1xi32> to vector<1x1xi32>
      %26 = vector.shape_cast %25 : vector<1x1xi32> to vector<1x1x1xi32>
      %c0_14 = arith.constant 0 : index
      %c0_15 = arith.constant 0 : index
      %c0_16 = arith.constant 0 : index
      %27 = vector.load %arg4[%c0_14, %c0_15, %c0_16] : memref<1x1x1xi32, #tpu.memory_space<vmem>>, vector<1x1x1xi32>
      tpu.vector_store %arg4[%c0_14, %c0_15, %c0_16], %26 {strides = array<i32>} : memref<1x1x1xi32, #tpu.memory_space<vmem>>, vector<1x1x1xi32>,
    } else {
    }
    return
  }
  func.func @transform_0(%arg0: i32, %arg1: i32) -> (i32, i32) {
    %c1_i32 = arith.constant 1 : i32
    %0 = arith.muli %arg0, %c1_i32 : i32
    %1 = arith.addi %0, %arg1 : i32
    %c0_i32 = arith.constant 0 : i32
    %c0_i32_0 = arith.constant 0 : i32
    return %c0_i32, %1 : i32, i32
  }
  func.func @transform_1(%arg0: i32, %arg1: i32) -> (i32, i32) {
    %c1_i32 = arith.constant 1 : i32
    %0 = arith.muli %arg0, %c1_i32 : i32
    %1 = arith.addi %0, %arg1 : i32
    %c0_i32 = arith.constant 0 : i32
    %c0_i32_0 = arith.constant 0 : i32
    return %c0_i32, %1 : i32, i32
  }
  func.func @transform_2(%arg0: i32, %arg1: i32) -> (i32, i32, i32) {
    %c0_i32 = arith.constant 0 : i32
    %c0_i32_0 = arith.constant 0 : i32
    %c0_i32_1 = arith.constant 0 : i32
    return %arg0, %c0_i32, %c0_i32_0 : i32, i32, i32
  }
}

</mosaic_0001>

<bundles_post_ra>
// kernel: tpu_custom_call.1
= control target key start
LH: loop header
LB: loop body
LE: loop exit
PB: predicated region body
PF: predicated region fallthrough
CT: control target
= control target key end

     0   :  { %7 = vsyncpa [#allocation4], 0  ;;  %s337_s0 = inlined_call_operand.hbm [shape: bf16[8,384], index: 0, kind: input, shape index: {}]   ;;  %s338_s1 = inlined_call_operand.hbm [shape: s32[1,384], index: 1, kind: input, shape index: {}]   ;;  %s339_s2 = inlined_call_operand.hbm [shape: s32[1,1,1], index: 2, kind: output, shape index: {}]  }
   0x1   :  { %8 = vsyncpa [#allocation7], 0 }
   0x2   :  { %9 = vsyncpa [#allocation5], 0  ;;  %s287_s9 = smov [#allocation3]   ;;  %s288_s11 = smov [#allocation6]  }
   0x3   :  { %s20_s10 = sshll.u32 %s287_s9, 4  ;;  %s34_s12 = sshll.u32 %s288_s11, 4  ;;  %s21_s10 = int_to_ptr.vmem [resolvable:$true] %s20_s10  ;;  %s35_s12 = int_to_ptr.vmem [resolvable:$true] %s34_s12 }
   0x4   :  { %s229_s13 = scalar_lea.vmem %s21_s10, 192  ;;  %p234_p1 = scmp.lt.s32.totalorder %s21_s10, %s21_s10 }
   0x5   :  { %p230_p0 = scmp.ne.s32.totalorder %s21_s10, %s229_s13  ;;  %p235_p2 = scmp.lt.s32.totalorder %s229_s13, %s229_s13 }
   0x7   :  { %p236_p3 = por %p235_p2, %p234_p1 }
   0x9   :  { %p237_p4 = pnand %p236_p3, %p230_p0 }
   0xb   :  { %240 = shalt.err (!%p237_p4)
}
   0xc   :  { %23 = dma.hbm_to_vmem [thread:$0]  %s337_s0, 192, %s21_s10, [#allocation4]  }
   0xd   :  { %s249_s16 = scalar_lea.vmem %s35_s12, 48  ;;  %s253_s17 = scalar_lea.vmem %s35_s12, 64 }
   0xe   :  { %p250_p5 = scmp.ne.s32.totalorder %s35_s12, %s249_s16  ;;  %p254_p6 = scmp.lt.s32.totalorder %s35_s12, %s35_s12 }
   0xf   :  { %p255_p7 = scmp.lt.s32.totalorder %s253_s17, %s249_s16 }
  0x11   :  { %p256_p8 = por %p255_p7, %p254_p6 }
  0x13   :  { %p257_p9 = pnand %p256_p8, %p250_p5 }
  0x15   :  { %260 = shalt.err (!%p257_p9)
}
  0x16   :  { %37 = dma.hbm_to_vmem [thread:$0]  %s338_s1, 48, %s35_s12, [#allocation7]  }
  0x17   :  { %281 = dma.done.wait [#allocation4], 192  }
  0x18   :  { %282 = vsyncadd [#allocation4], 4294967104 }
  0x19   :  { %283 = dma.done.wait [#allocation7], 48  }
  0x1a   :  { %284 = vsyncadd [#allocation7], 4294967248  ;;  %v52_v0 = vlaneseq  ;;  %v289_v2 = vmov 0   ;;  %v57_v3 = vld [vmem:[#allocation3] sm:$0xff]  ;;  %v58_v4 = vld [vmem:[#allocation3 + $0x8] sm:$0xf] }
  0x1b   :  { %v59_v5 = vunpack.c.l.bf16 %v57_v3  ;;  %v60_v6 = vunpack.c.h.bf16 %v57_v3  ;;  %v61_v7 = vunpack.c.l.bf16 %v58_v4  ;;  %v290_v33 = vmov 1966171168   ;;  %v62_v36 = vld [vmem:[#allocation6] sm:$0x7]  ;;  %s291_s0 = smov [#allocation8]  }
  0x1c   :  { %vm313_vm0 = vcmp.lt.s32.totalorder %v52_v0, 384  ;;  %v320_v23 = vshrl.u32 %v52_v0, 7  ;;  %v137_v34 = vunpack.c.l.s4 %v290_v33  ;;  %s206_s1 = sshll.u32 %s291_s0, 4  ;;  %s207_s1 = int_to_ptr.vmem [resolvable:$true] %s206_s1 }
  0x1d   :  { %56 = vst.msk [vmem:[#allocation2] sm:$0x7] %vm313_vm0, %v289_v2  ;;  %v65_v8 = vrot.slane %v59_v5, 4  ;;  %v71_v9 = vrot.slane %v60_v6, 4  ;;  %v77_v10 = vrot.slane %v61_v7, 4  ;;  %s261_s20 = scalar_lea.vmem %s207_s1, 16  ;;  %p266_p11 = scmp.lt.s32.totalorder %s207_s1, %s207_s1 }
  0x1e   :  { %v119_v35 = vsub.s32 0, %v320_v23  ;;  %v123_v40 = vsub.s32 1, %v320_v23  ;;  %v127_v44 = vsub.s32 2, %v320_v23  ;;  %v138_v45 = vunpack.c.0.s8 %v137_v34  ;;  %p262_p10 = scmp.ne.s32.totalorder %s207_s1, %s261_s20  ;;  %s265_s21 = scalar_lea.vmem %s207_s1, 32 }
  0x1f   :  { %v66_v11 = vmax.f32 %v59_v5, %v65_v8  ;;  %v72_v12 = vmax.f32 %v60_v6, %v71_v9  ;;  %v78_v13 = vmax.f32 %v61_v7, %v77_v10  ;;  %p267_p12 = scmp.lt.s32.totalorder %s265_s21, %s261_s20 }
  0x20   :  { %v120_v46 = vrot.slane %v62_v36, %v119_v35  ;;  %v124_v50 = vrot.slane %v62_v36, %v123_v40  ;;  %v128_v54 = vrot.slane %v62_v36, %v127_v44  ;;  %v141_v55 = vsub.s32 %v138_v45, %v320_v23 }
  0x21   :  { %v67_v14 = vrot.slane %v66_v11, 2  ;;  %v73_v15 = vrot.slane %v72_v12, 2  ;;  %v79_v16 = vrot.slane %v78_v13, 2  ;;  %p268_p13 = por %p267_p12, %p266_p11 }
  0x23   :  { %v68_v17 = vmax.f32 %v66_v11, %v67_v14  ;;  %v74_v18 = vmax.f32 %v72_v12, %v73_v15  ;;  %v80_v19 = vmax.f32 %v78_v13, %v79_v16  ;;  %p269_p0 = pnand %p268_p13, %p262_p10 }
  0x24   :  { %v116_v4 = vld [vmem:[#allocation2] sm:$0x7] }
  0x25   :  { %v69_v20 = vrot.slane %v68_v17, 1  ;;  %v75_v21 = vrot.slane %v74_v18, 1  ;;  %v81_v22 = vrot.slane %v80_v19, 1 }
  0x27   :  { %v70_v24 = vmax.f32 %v68_v17, %v69_v20  ;;  %v76_v25 = vmax.f32 %v74_v18, %v75_v21  ;;  %v82_v26 = vmax.f32 %v80_v19, %v81_v22 }
  0x29   :  { %vm83_vm1 = vcmp.eq.f32.partialorder %v59_v5, %v70_v24  ;;  %vm84_vm2 = vcmp.eq.f32.partialorder %v60_v6, %v76_v25  ;;  %vm85_vm3 = vcmp.eq.f32.partialorder %v61_v7, %v82_v26 }
  0x2a   :  { %v86_v27 = vsel %vm83_vm1, %v320_v23, 8  ;;  %v87_v28 = vsel %vm84_vm2, %v320_v23, 8  ;;  %v88_v29 = vsel %vm85_vm3, %v320_v23, 8  ;;  %vm180_vm1 = vcmask 1040384  }
  0x2b   :  { %v89_v30 = vrot.slane %v86_v27, 4  ;;  %v98_v31 = vrot.slane %v87_v28, 4  ;;  %v107_v32 = vrot.slane %v88_v29, 4 }
  0x2d   :  { %vm90_vm4 = vcmp.lt.s32.totalorder %v86_v27, %v89_v30  ;;  %vm99_vm5 = vcmp.lt.s32.totalorder %v87_v28, %v98_v31  ;;  %vm108_vm6 = vcmp.lt.s32.totalorder %v88_v29, %v107_v32 }
  0x2e   :  { %v91_v37 = vsel %vm90_vm4, %v86_v27, %v89_v30  ;;  %v100_v38 = vsel %vm99_vm5, %v87_v28, %v98_v31  ;;  %v109_v39 = vsel %vm108_vm6, %v88_v29, %v107_v32 }
  0x2f   :  { %v92_v41 = vrot.slane %v91_v37, 2  ;;  %v101_v42 = vrot.slane %v100_v38, 2  ;;  %v110_v43 = vrot.slane %v109_v39, 2 }
  0x31   :  { %vm93_vm7 = vcmp.lt.s32.totalorder %v91_v37, %v92_v41  ;;  %vm102_vm8 = vcmp.lt.s32.totalorder %v100_v38, %v101_v42  ;;  %vm111_vm9 = vcmp.lt.s32.totalorder %v109_v39, %v110_v43 }
  0x32   :  { %v94_v47 = vsel %vm93_vm7, %v91_v37, %v92_v41  ;;  %v103_v48 = vsel %vm102_vm8, %v100_v38, %v101_v42  ;;  %v112_v49 = vsel %vm111_vm9, %v109_v39, %v110_v43 }
  0x33   :  { %v95_v51 = vrot.slane %v94_v47, 1  ;;  %v104_v52 = vrot.slane %v103_v48, 1  ;;  %v113_v53 = vrot.slane %v112_v49, 1 }
  0x35   :  { %vm96_vm10 = vcmp.lt.s32.totalorder %v94_v47, %v95_v51  ;;  %vm105_vm11 = vcmp.lt.s32.totalorder %v103_v48, %v104_v52  ;;  %vm114_vm12 = vcmp.lt.s32.totalorder %v112_v49, %v113_v53 }
  0x36   :  { %v97_v56 = vsel %vm96_vm10, %v94_v47, %v95_v51  ;;  %v106_v57 = vsel %vm105_vm11, %v103_v48, %v104_v52  ;;  %v115_v58 = vsel %vm114_vm12, %v112_v49, %v113_v53 }
  0x37   :  { %vm129_vm13 = vcmp.eq.s32.totalorder %v97_v56, %v120_v46  ;;  %vm130_vm14 = vcmp.eq.s32.totalorder %v106_v57, %v124_v50  ;;  %vm131_vm15 = vcmp.eq.s32.totalorder %v115_v58, %v128_v54 }
  0x38   :  { %v132_v59 = vsel %vm129_vm13, 1, %v289_v2  ;;  %v133_v60 = vsel %vm130_vm14, 1, %v289_v2  ;;  %v134_v61 = vsel %vm131_vm15, 1, %v289_v2 }
  0x39   :  { %v135_v62 = vcombine.low %v132_v59, %v133_v60  ;;  %v149_v63 = vrot.slane %v134_v61, %v141_v55 }
  0x3b   :  { %v142_v0 = vrot.slane %v135_v62, %v141_v55 }
  0x3d   :  { %v150_v3 = vcombine.low %v142_v0, %v149_v63 }
  0x3f   :  { %v157_v5 = vrot.slane %v150_v3, %v141_v55 }
  0x41   :  { %v158_v6 = vadd.s32 %v157_v5, %v116_v4 }
  0x43   :  { %163 = vst.msk [vmem:[#allocation2] sm:$0x7] %vm313_vm0, %v158_v6  ;;  %vm198_vm0 = vcmask 0  }
  0x4a   :  { %v167_v7 = vld [vmem:[#allocation2] sm:$0x7] }
  0x4b   :  { %v171_v8 = vrot.slane %v167_v7, %v119_v35  ;;  %v175_v9 = vrot.slane %v167_v7, %v123_v40  ;;  %v179_v10 = vrot.slane %v167_v7, %v127_v44 }
  0x4d   :  { %v181_v11 = vsel %vm180_vm1, %v171_v8, 0  ;;  %v182_v12 = vsel %vm180_vm1, %v175_v9, 0  ;;  %v183_v13 = vsel %vm180_vm1, %v179_v10, 0 }
  0x4e   :  { %v184_v14 = vadd.s32 %v182_v12, %v181_v11 }
  0x50   :  { %v185_v2 = vadd.s32 %v184_v14, %v183_v13 }
  0x52   :  { %v187_v15 = vshrl.u32 %v185_v2, 16  ;;  %v186_v16 = vand.u32 65535, %v185_v2 }
  0x54   :  { %v189_v17 = vcvt.s32.f32 %v187_v15  ;;  %v188_v18 = vcvt.s32.f32 %v186_v16 }
  0x56   :  { %192 = vadd.xlane.f32.xlu0 %v189_v17 }
  0x5a   :  { %190 = vadd.xlane.f32.xlu0 %v188_v18 }
  0xdf   :  { %v193_v19 = vpop.xlane.xlu0 %192 }
  0xe0   :  { %v195_v20 = vcvt.f32.s32 %v193_v19 }
  0xe2   :  { %v196_v21 = vshll.u32 %v195_v20, 16 }
  0xe3   :  { %v191_v1 = vpop.xlane.xlu0 %190 }
  0xe4   :  { %v194_v22 = vcvt.f32.s32 %v191_v1 }
  0xe6   :  { %v197_v23 = vadd.s32 %v196_v21, %v194_v22 }
  0xe8   :  { %199 = vst.msk [vmem:[#allocation8] sm:$0x1] %vm198_vm0, %v197_v23 }
  0xe9   :  { %272 = shalt.err (!%p269_p0)
}
  0xea   :  { %209 = dma.vmem_to_hbm [thread:$0]  %s207_s1, 16, %s339_s2, [#allocation5]  }
  0xeb   :  { %285 = dma.done.wait [#allocation5], 16  }
  0xec   :  { %286 = vsyncadd [#allocation5], 4294967280 }
  0xed   :  { %213 = vsyncpa [#allocation4], 1 }
  0xee   :  { %214 = vsyncpa [#allocation7], 1 }
  0xef   :  { %215 = vsyncpa [#allocation5], 1 }

</bundles_post_ra>
